<compile_context>
chip_gen: v7x
topology: tpu7x:2x2x1
jax: 0.10.0
libtpu: 0.0.40
codegen_flags: <defaults>
</compile_context>

<pallas_src>
import functools

import jax
import jax.numpy as jnp
from jax.experimental import pallas as pl
from jax.experimental.pallas import tpu as pltpu

PAD = 128            # lane-aligned padded width for all layers
HEAD_ROWS = 8        # w1 / b1 / b2 / b3 live in the first 8-row tile
W2_ROW0 = HEAD_ROWS              # 8
W3_ROW0 = W2_ROW0 + PAD          # 136
TOTAL_ROWS = W3_ROW0 + PAD       # 264  -> slab is (264, 128) f32 ~= 132 KiB


def _mlp_kernel(slab_ref, o_ref):
    # One (8,128) vreg load covers w1, b1, b2, b3.
    head = slab_ref[0:HEAD_ROWS, :]
    w1 = head[0:1, :]
    b1 = head[1:2, :]
    b2 = head[2:3, :]
    b3 = head[3:4, :]

    # Layer 1: Linear(1, 100) + ReLU with x == 1  =>  relu(w1 + b1).
    h1 = jnp.maximum(w1 + b1, 0.0)                               # (1, 128)

    # Layer 2: Linear(100, 50) + ReLU (MXU matmul, f32 accumulate).
    w2 = slab_ref[W2_ROW0:W2_ROW0 + PAD, :]                      # (128, 128)
    h2 = jnp.dot(h1, w2, preferred_element_type=jnp.float32)
    h2 = jnp.maximum(h2 + b2, 0.0)                               # (1, 128)

    # Layer 3: Linear(50, 2) + Tanh.
    w3 = slab_ref[W3_ROW0:W3_ROW0 + PAD, :]                      # (128, 128)
    o = jnp.dot(h2, w3, preferred_element_type=jnp.float32)
    o = jnp.tanh(o + b3)                                         # (1, 128)

    # Fold the sigma epilogue (+1.0 on lane 1) into the kernel.
    lane = jax.lax.broadcasted_iota(jnp.int32, o.shape, 1)
    o_ref[...] = o + jnp.where(lane == 1, 1.0, 0.0)              # unmasked (1,128) store


@jax.jit
def univariate_normal_forward(param_slab):
    """Whole MLP forward in one Pallas kernel.

    Returns a (2,) vector [mu, sigma]; the slice is fused inside the jit so
    the host sees a single dispatch + one tiny result.
    """
    vmem = pl.BlockSpec(memory_space=pltpu.MemorySpace.VMEM)
    o = pl.pallas_call(
        _mlp_kernel,
        out_shape=jax.ShapeDtypeStruct((1, PAD), jnp.float32),
        in_specs=[vmem],
        out_specs=vmem,
    )(param_slab)
    return o[0, :2]   # [mu, sigma]; sigma already has the +1.0 applied


def init_params(key):
    """Deterministic PyTorch-style init: U(-1/sqrt(fan_in), 1/sqrt(fan_in)).

    Weights are kept as (in_features, out_features); biases as (1, out)."""
    def linear(key, fan_in, fan_out):
        kw, kb = jax.random.split(key)
        bound = 1.0 / jnp.sqrt(float(fan_in))
        w = jax.random.uniform(kw, (fan_in, fan_out), jnp.float32, -bound, bound)
        b = jax.random.uniform(kb, (1, fan_out), jnp.float32, -bound, bound)
        return w, b

    k1, k2, k3 = jax.random.split(key, 3)
    w1, b1 = linear(k1, 1, 100)
    w2, b2 = linear(k2, 100, 50)
    w3, b3 = linear(k3, 50, 2)
    return (w1, b1, w2, b2, w3, b3)


def pack_params(params):
    """Zero-pad every layer to 128 lanes and pack all params into one
    (264, 128) f32 slab with 8-row-aligned segments (done once, off the hot
    path).  Zero padding is exact: ReLU(0)=0, tanh(0)=0, and padded weight
    rows/cols are zero, so padded lanes never contaminate mu/sigma."""
    w1, b1, w2, b2, w3, b3 = params
    slab = jnp.zeros((TOTAL_ROWS, PAD), jnp.float32)
    slab = slab.at[0, : w1.shape[1]].set(w1[0])
    slab = slab.at[1, : b1.shape[1]].set(b1[0])
    slab = slab.at[2, : b2.shape[1]].set(b2[0])
    slab = slab.at[3, : b3.shape[1]].set(b3[0])
    slab = slab.at[W2_ROW0 : W2_ROW0 + w2.shape[0], : w2.shape[1]].set(w2)
    slab = slab.at[W3_ROW0 : W3_ROW0 + w3.shape[0], : w3.shape[1]].set(w3)
    return slab


if __name__ == "__main__":
    params = init_params(jax.random.PRNGKey(0))
    slab = pack_params(params)

    out = univariate_normal_forward(slab)
    out = jax.block_until_ready(out)
    mu, sigma = out[0], out[1]

    # Pure-JAX reference of the same math (un-padded params).
    w1, b1, w2, b2, w3, b3 = params
    x = jnp.ones((1, 1), jnp.float32)
    o1 = jnp.maximum(x @ w1 + b1, 0.0)
    o2 = jnp.maximum(o1 @ w2 + b2, 0.0)
    o = jnp.tanh(o2 @ w3 + b3)
    ref_mu, ref_sigma = o[0, 0], o[0, 1] + 1.0
    assert jnp.allclose(mu, ref_mu, atol=1e-5), (mu, ref_mu)
    assert jnp.allclose(sigma, ref_sigma, atol=1e-5), (sigma, ref_sigma)

    print("KERNEL_OK")
</pallas_src>

<mosaic_0001>
module attributes {stable_mosaic.version = 11 : i64} {
  func.func @_mlp_kernel(%arg0: memref<264x128xf32, #tpu.memory_space<vmem>>, %arg1: memref<1x128xf32, #tpu.memory_space<vmem>>) attributes {dimension_semantics = [], scalar_prefetch = 0 : i64, scratch_operands = 0 : i64, tpu.core_type = #tpu.core_type<tc>} {
    %c0 = arith.constant 0 : index
    %c0_0 = arith.constant 0 : index
    %0 = vector.load %arg0[%c0, %c0_0] : memref<264x128xf32, #tpu.memory_space<vmem>>, vector<8x128xf32>
    %1 = vector.extract_strided_slice %0 {offsets = [0, 0], sizes = [1, 128], strides = [1, 1]} : vector<8x128xf32> to vector<1x128xf32>
    %2 = vector.extract_strided_slice %0 {offsets = [1, 0], sizes = [1, 128], strides = [1, 1]} : vector<8x128xf32> to vector<1x128xf32>
    %3 = vector.extract_strided_slice %0 {offsets = [2, 0], sizes = [1, 128], strides = [1, 1]} : vector<8x128xf32> to vector<1x128xf32>
    %4 = vector.extract_strided_slice %0 {offsets = [3, 0], sizes = [1, 128], strides = [1, 1]} : vector<8x128xf32> to vector<1x128xf32>
    %5 = arith.addf %1, %2 : vector<1x128xf32>
    %cst = arith.constant 0.000000e+00 : f32
    %6 = vector.broadcast %cst : f32 to vector<1x128xf32>
    %7 = arith.maximumf %5, %6 : vector<1x128xf32>
    %c8 = arith.constant 8 : index
    %c0_1 = arith.constant 0 : index
    %8 = vector.load %arg0[%c8, %c0_1] : memref<264x128xf32, #tpu.memory_space<vmem>>, vector<128x128xf32>
    %cst_2 = arith.constant dense<0.000000e+00> : vector<1x128xf32>
    %9 = tpu.matmul %7, %8, %cst_2 {dimension_numbers = #tpu.dot_dimension_numbers<[1], [0], [0], [1], [0, 0, 1, 1], [], []>} : vector<1x128xf32>, vector<128x128xf32>, vector<1x128xf32> -> vector<1x128xf32>
    %10 = arith.addf %9, %3 : vector<1x128xf32>
    %cst_3 = arith.constant 0.000000e+00 : f32
    %11 = vector.broadcast %cst_3 : f32 to vector<1x128xf32>
    %12 = arith.maximumf %10, %11 : vector<1x128xf32>
    %c136 = arith.constant 136 : index
    %c0_4 = arith.constant 0 : index
    %13 = vector.load %arg0[%c136, %c0_4] : memref<264x128xf32, #tpu.memory_space<vmem>>, vector<128x128xf32>
    %cst_5 = arith.constant dense<0.000000e+00> : vector<1x128xf32>
    %14 = tpu.matmul %12, %13, %cst_5 {dimension_numbers = #tpu.dot_dimension_numbers<[1], [0], [0], [1], [0, 0, 1, 1], [], []>} : vector<1x128xf32>, vector<128x128xf32>, vector<1x128xf32> -> vector<1x128xf32>
    %15 = arith.addf %14, %4 : vector<1x128xf32>
    %16 = math.tanh %15 : vector<1x128xf32>
    %17 = tpu.iota {dimensions = array<i32: 1>} : vector<1x128xi32>
    %c1_i32 = arith.constant 1 : i32
    %18 = vector.broadcast %c1_i32 : i32 to vector<1x128xi32>
    %19 = arith.cmpi eq, %17, %18 : vector<1x128xi32>
    %cst_6 = arith.constant 1.000000e+00 : f32
    %cst_7 = arith.constant 0.000000e+00 : f32
    %20 = vector.broadcast %cst_6 : f32 to vector<1x128xf32>
    %21 = vector.broadcast %cst_7 : f32 to vector<1x128xf32>
    %22 = arith.select %19, %20, %21 : vector<1x128xi1>, vector<1x128xf32>
    %23 = arith.addf %16, %22 : vector<1x128xf32>
    %c0_8 = arith.constant 0 : index
    %c0_9 = arith.constant 0 : index
    %24 = vector.load %arg1[%c0_8, %c0_9] : memref<1x128xf32, #tpu.memory_space<vmem>>, vector<1x128xf32>
    tpu.vector_store %arg1[%c0_8, %c0_9], %23 {strides = array<i32>} : memref<1x128xf32, #tpu.memory_space<vmem>>, vector<1x128xf32>,
    return
  }
}

</mosaic_0001>

<bundles_post_ra>
// kernel: univariate_normal_forward.1
= control target key start
LH: loop header
LB: loop body
LE: loop exit
PB: predicated region body
PF: predicated region fallthrough
CT: control target
= control target key end

     0   :  { %6 = vsyncpa [#allocation3], 0  ;;  %s401_s6 = smov [#allocation2]   ;;  %s451_s0 = inlined_call_operand.hbm [shape: f32[264,128], index: 0, kind: input, shape index: {}]   ;;  %s452_s1 = inlined_call_operand.vmem [shape: f32[1,128], index: 1, kind: output, shape index: {}]  }
   0x1   :  { %s12_s7 = sshll.u32 %s401_s6, 4  ;;  %s377_s10 = scalar_lea.hbm %s451_s0, 4224  ;;  %s13_s7 = int_to_ptr.vmem [resolvable:$true] %s12_s7 }
   0x2   :  { %p378_p0 = scmp.ne.s32.totalorder %s451_s0, %s377_s10  ;;  %p381_p1 = scmp.lt.u32.totalorder %s377_s10, %s451_s0 }
   0x4   :  { %p383_p2 = pnand %p381_p1, %p378_p0 }
   0x6   :  { %386 = shalt.err (!%p383_p2)
}
   0x7   :  { %s387_s15 = scalar_lea.vmem %s13_s7, 4224  ;;  %p392_p4 = scmp.lt.s32.totalorder %s13_s7, %s13_s7 }
   0x8   :  { %p388_p3 = scmp.ne.s32.totalorder %s13_s7, %s387_s15  ;;  %p393_p5 = scmp.lt.s32.totalorder %s387_s15, %s387_s15 }
   0xa   :  { %p394_p6 = por %p393_p5, %p392_p4 }
   0xc   :  { %p395_p7 = pnand %p394_p6, %p388_p3 }
   0xe   :  { %398 = shalt.err (!%p395_p7)
}
   0xf   :  { %s402_s16 = smov 128   ;;  %s403_s17 = smov 8  }
  0x10   :  { %18 = dma.hbm_to_vmem [thread:$0]  %s451_s0, 4224, %s13_s7, [#allocation3], %s402_s16, %s402_s16, %s403_s17  }
  0x11   :  { %399 = dma.done.wait [#allocation3], 4224  }
  0x12   :  { %400 = vsyncadd [#allocation3], 4294963072  ;;  %v404_v0 = vmov 0.0|0.0   ;;  %vm405_vm0 = vmmov 0   ;;  %v406_v1 = vmov 0.0   ;;  %v28_v2 = vld [vmem:[#allocation2 + $0x8] sm:$0xff]  ;;  %v206_v60 = vlaneseq }
  0x13   :  { %321 = vmatprep.subr.bf16.mxu0 %v404_v0  ;;  %283 = vmatprep.mubr.msk.f32.mxu0 %vm405_vm0, %v406_v1  ;;  %v29_v3 = vld [vmem:[#allocation2 + $0x10] sm:$0xff]  ;;  %v30_v4 = vld [vmem:[#allocation2 + $0x18] sm:$0xff]  ;;  %v31_v6 = vld [vmem:[#allocation2 + $0x20] sm:$0xff] }
  0x14   :  { %345 = vmatprep.subr.bf16.mxu1 %v404_v0  ;;  %318 = vmatprep.mubr.msk.f32.mxu1 %vm405_vm0, %v406_v1  ;;  %v322_v5 = vpack.c.bf16 %v29_v3, %v28_v2  ;;  %v325_v7 = vpack.c.bf16 %v31_v6, %v30_v4  ;;  %v32_v8 = vld [vmem:[#allocation2 + $0x28] sm:$0xff]  ;;  %v33_v9 = vld [vmem:[#allocation2 + $0x30] sm:$0xff]  ;;  %v119_v12 = vld [vmem:[#allocation2 + $0x98] sm:$0xff]  ;;  %v207_v2 = vand.u32 127, %v206_v60 }
  0x15   :  { %v117_v10 = vld [vmem:[#allocation2 + $0x88] sm:$0xff]  ;;  %v118_v11 = vld [vmem:[#allocation2 + $0x90] sm:$0xff]  ;;  %v120_v13 = vld [vmem:[#allocation2 + $0xa0] sm:$0xff]  ;;  %v328_v14 = vpack.c.bf16 %v33_v9, %v32_v8 }
  0x16   :  { %323 = vmatpush3.bf16.msra.mxu0 %v322_v5  ;;  %v346_v15 = vpack.c.bf16 %v118_v11, %v117_v10  ;;  %v34_v16 = vld [vmem:[#allocation2 + $0x38] sm:$0xff]  ;;  %v35_v17 = vld [vmem:[#allocation2 + $0x40] sm:$0xff]  ;;  %v349_v18 = vpack.c.bf16 %v120_v13, %v119_v12  ;;  %v121_v19 = vld [vmem:[#allocation2 + $0xa8] sm:$0xff]  ;;  %vm208_vm1 = vcmp.eq.s32.totalorder %v207_v2, 1 }
  0x17   :  { %324 = vmatprep.subr.bf16.mxu0 %v404_v0  ;;  %v122_v20 = vld [vmem:[#allocation2 + $0xb0] sm:$0xff]  ;;  %v331_v21 = vpack.c.bf16 %v35_v17, %v34_v16  ;;  %v36_v22 = vld [vmem:[#allocation2 + $0x48] sm:$0xff]  ;;  %v123_v25 = vld [vmem:[#allocation2 + $0xb8] sm:$0xff] }
  0x18   :  { %347 = vmatpush3.bf16.msra.mxu1 %v346_v15  ;;  %v37_v23 = vld [vmem:[#allocation2 + $0x50] sm:$0xff]  ;;  %v352_v24 = vpack.c.bf16 %v122_v20, %v121_v19  ;;  %v124_v26 = vld [vmem:[#allocation2 + $0xc0] sm:$0xff]  ;;  %v38_v28 = vld [vmem:[#allocation2 + $0x58] sm:$0xff] }
  0x19   :  { %348 = vmatprep.subr.bf16.mxu1 %v404_v0  ;;  %v334_v27 = vpack.c.bf16 %v37_v23, %v36_v22  ;;  %v39_v29 = vld [vmem:[#allocation2 + $0x60] sm:$0xff]  ;;  %v355_v30 = vpack.c.bf16 %v124_v26, %v123_v25  ;;  %v125_v31 = vld [vmem:[#allocation2 + $0xc8] sm:$0xff]  ;;  %v126_v32 = vld [vmem:[#allocation2 + $0xd0] sm:$0xff] }
  0x1a   :  { %326 = vmatpush3.bf16.msra.mxu0 %v325_v7  ;;  %v337_v33 = vpack.c.bf16 %v39_v29, %v38_v28  ;;  %v22_v34 = vld [vmem:[#allocation2] sm:$0xff]  ;;  %v40_v35 = vld [vmem:[#allocation2 + $0x68] sm:$0xff]  ;;  %v41_v36 = vld [vmem:[#allocation2 + $0x70] sm:$0xff]  ;;  %v358_v37 = vpack.c.bf16 %v126_v32, %v125_v31 }
  0x1b   :  { %327 = vmatprep.subr.bf16.mxu0 %v404_v0  ;;  %v24_v38 = vrot.slane %v22_v34, 1  ;;  %v127_v39 = vld [vmem:[#allocation2 + $0xd8] sm:$0xff]  ;;  %v128_v40 = vld [vmem:[#allocation2 + $0xe0] sm:$0xff]  ;;  %v340_v41 = vpack.c.bf16 %v41_v36, %v40_v35  ;;  %v129_v46 = vld [vmem:[#allocation2 + $0xe8] sm:$0xff]  ;;  %v44_v54 = vrot.slane %v22_v34, 2  ;;  %v133_v59 = vrot.slane %v22_v34, 3 }
  0x1c   :  { %350 = vmatpush3.bf16.msra.mxu1 %v349_v18  ;;  %v42_v42 = vld [vmem:[#allocation2 + $0x78] sm:$0xff]  ;;  %v43_v43 = vld [vmem:[#allocation2 + $0x80] sm:$0xff]  ;;  %v361_v44 = vpack.c.bf16 %v128_v40, %v127_v39  ;;  %v130_v47 = vld [vmem:[#allocation2 + $0xf0] sm:$0xff] }
  0x1d   :  { %351 = vmatprep.subr.bf16.mxu1 %v404_v0  ;;  %v26_v45 = vadd.f32 %v24_v38, %v22_v34  ;;  %v343_v48 = vpack.c.bf16 %v43_v43, %v42_v42  ;;  %v364_v49 = vpack.c.bf16 %v130_v47, %v129_v46  ;;  %v131_v51 = vld [vmem:[#allocation2 + $0xf8] sm:$0xff]  ;;  %v132_v52 = vld [vmem:[#allocation2 + $0x100] sm:$0xff] }
  0x1e   :  { %329 = vmatpush3.bf16.msra.mxu0 %v328_v14  ;;  %v367_v53 = vpack.c.bf16 %v132_v52, %v131_v51 }
  0x1f   :  { %330 = vmatprep.subr.bf16.mxu0 %v404_v0  ;;  %v27_v50 = vmax.f32 %v26_v45, 0.0 }
  0x20   :  { %353 = vmatpush3.bf16.msra.mxu1 %v352_v24 }
  0x21   :  { %354 = vmatprep.subr.bf16.mxu1 %v404_v0 }
  0x22   :  { %332 = vmatpush3.bf16.msra.mxu0 %v331_v21 }
  0x23   :  { %333 = vmatprep.subr.bf16.mxu0 %v404_v0 }
  0x24   :  { %356 = vmatpush3.bf16.msra.mxu1 %v355_v30 }
  0x25   :  { %357 = vmatprep.subr.bf16.mxu1 %v404_v0 }
  0x26   :  { %335 = vmatpush3.bf16.msra.mxu0 %v334_v27 }
  0x27   :  { %336 = vmatprep.subr.bf16.mxu0 %v404_v0 }
  0x28   :  { %359 = vmatpush3.bf16.msra.mxu1 %v358_v37 }
  0x29   :  { %360 = vmatprep.subr.bf16.mxu1 %v404_v0 }
  0x2a   :  { %338 = vmatpush3.bf16.msra.mxu0 %v337_v33 }
  0x2b   :  { %339 = vmatprep.subr.bf16.mxu0 %v404_v0 }
  0x2c   :  { %362 = vmatpush3.bf16.msra.mxu1 %v361_v44 }
  0x2d   :  { %363 = vmatprep.subr.bf16.mxu1 %v404_v0 }
  0x2e   :  { %341 = vmatpush3.bf16.msra.mxu0 %v340_v41 }
  0x2f   :  { %342 = vmatprep.subr.bf16.mxu0 %v404_v0 }
  0x30   :  { %365 = vmatpush3.bf16.msra.mxu1 %v364_v49 }
  0x31   :  { %366 = vmatprep.subr.bf16.mxu1 %v404_v0  ;;  %v209_v0 = vsel %vm208_vm1, 1.0, %v406_v1 }
  0x32   :  { %344 = vmatpush3.bf16.msra.mxu0 %v343_v48 }
  0x34   :  { %368 = vmatpush3.bf16.msra.mxu1 %v367_v53 }
  0x35   :  { %284 = vmatmul.mubr.f32.vlgmr.msra.gmra.mrb[0].mxu0 %v27_v50 }
 0x108   :  { %v112_v55 = vpop.f32.mrb[0].mxu0 }
 0x109   :  { %v113_v56 = vadd.f32 %v112_v55, %v44_v54  ;;  %v285_v57 = vpop.f32.mrb[1].mxu0 }
 0x10b   :  { %v116_v58 = vmax.f32 %v113_v56, 0.0 }
 0x10d   :  { %319 = vmatmul.mubr.f32.vlgmr.msra.gmra.mrb[0].mxu1 %v116_v58 }
 0x1e0   :  { %v201_v61 = vpop.f32.mrb[0].mxu1 }
 0x1e1   :  { %v202_v62 = vadd.f32 %v201_v61, %v133_v59  ;;  %v320_v63 = vpop.f32.mrb[1].mxu1 }
 0x1e3   :  { %375 = vtanh.f32 %v202_v62 }
 0x1ed   :  { %v376_v3 = vpop.eup %375 }
 0x1ee   :  { %v210_v4 = vadd.f32 %v376_v3, %v209_v0 }
 0x1f0   :  { %211 = vst [vmem:[%s452_s1] sm:$0x1] %v210_v4 }
 0x1f1   :  { %216 = vsyncpa [#allocation3], 1 }

</bundles_post_ra>
